<compile_context>
chip_gen: v5e
topology: v5e:2x2
jax: 0.10.0
libtpu: 0.0.40
codegen_flags: <defaults>
</compile_context>

<pallas_src>
from math import sqrt
from typing import NamedTuple

import jax
import jax.numpy as jnp
from jax.experimental import pallas as pl
from jax.experimental.pallas import tpu as pltpu


# ----------------------------------------------------------------------------- helpers
def _round_up(x: int, m: int) -> int:
    return ((x + m - 1) // m) * m


def _cdiv(a: int, b: int) -> int:
    return -(-a // b)


_NOMINAL_TM = 256  # nominal M tile used when sizing the single-K-tile fast path


def _vmem_budget_bytes() -> int:
    """Per-TensorCore VMEM budget with headroom for Mosaic internal scratch."""
    cap = 64 * 2**20  # conservative fallback (v7x per-TC capacity)
    try:
        info = pltpu.get_tpu_info()
        cap = int(getattr(info, "vmem_capacity_bytes", cap))
    except Exception:
        pass
    # ~78% of capacity: ~50 MiB on v7x (64 MiB/TC), ~100 MiB on v5e/v6e (128 MiB).
    return int(cap * 0.78)


def _vmem_needed(tm, tk, tn, x_it, w_it, out_it, k_tiles) -> int:
    acc = tm * tn * 4 if k_tiles > 1 else 0
    return (
        2 * tm * tk * x_it        # x tiles (double-buffered)
        + 2 * tk * tn * w_it      # weight tiles (double-buffered)
        + 2 * tn * 4              # bias (f32)
        + 2 * tm * tn * out_it    # output tiles (double-buffered)
        + acc                     # f32 accumulator scratch (multi-K only)
    )


def _kn_geometry(nf, target_window, tile_n, tile_k, w_itemsize, prefer_single_k_tile):
    """Balanced N/K tiling shared by param prep and the forward wrapper."""
    budget = _vmem_budget_bytes()

    tw128 = _round_up(target_window, 128)
    n_tiles = _cdiv(tw128, max(tile_n, 128))
    tn = _round_up(_cdiv(tw128, n_tiles), 128)
    tw_pad = n_tiles * tn

    nf128 = _round_up(nf, 128)
    if prefer_single_k_tile:
        # Single K tile: weight VMEM-resident, no accumulator / init-finalize steps,
        # no per-M-tile re-stream of the weight. Use it when it comfortably fits.
        single_k_bytes = _vmem_needed(_NOMINAL_TM, nf128, tn, 4, w_itemsize, 4, 1)
        if single_k_bytes <= budget // 2:
            return nf128, 1, nf128, tn, n_tiles, tw_pad

    k_tiles = _cdiv(nf128, max(tile_k, 128))
    tk = _round_up(_cdiv(nf128, k_tiles), 128)
    nf_pad = k_tiles * tk  # minimal (<= (k_tiles-1)*128 of padding, usually 0)
    return tk, k_tiles, nf_pad, tn, n_tiles, tw_pad


def _m_geometry(M, tile_m, n_tiles, min_parallel_tiles=2):
    """Balanced M tiling; guarantee >=2 parallel tiles when cheap (v7x 2 TCs)."""
    M8 = _round_up(M, 8)
    m_tiles = _cdiv(M8, max(tile_m, 8))
    if m_tiles * n_tiles < min_parallel_tiles and M8 >= 8 * min_parallel_tiles:
        m_tiles = max(m_tiles, min_parallel_tiles)
    if m_tiles == 1:
        # Full-extent block: no (8,·) divisibility requirement, no M padding needed.
        return M, 1, M
    tm = _round_up(_cdiv(M8, m_tiles), 8)
    m_pad = m_tiles * tm
    return tm, m_tiles, m_pad


# ----------------------------------------------------------------------------- kernels
def _fh_kernel_single_k(x_ref, w_ref, b_ref, o_ref):
    # x_ref: [tm, nf_pad]  w_ref: [nf_pad, tn]  b_ref: [1, tn] f32  o_ref: [tm, tn]
    acc = jnp.dot(
        x_ref[...].astype(w_ref.dtype), w_ref[...], preferred_element_type=jnp.float32
    )
    o_ref[...] = (acc + b_ref[...]).astype(o_ref.dtype)


def _fh_kernel_multi_k(x_ref, w_ref, b_ref, o_ref, acc_ref):
    # x_ref: [tm, tk]  w_ref: [tk, tn]  b_ref: [1, tn]  o_ref/acc_ref: [tm, tn]
    k = pl.program_id(2)

    @pl.when(k == 0)
    def _():
        acc_ref[...] = jnp.zeros_like(acc_ref)

    acc_ref[...] += jnp.dot(
        x_ref[...].astype(w_ref.dtype), w_ref[...], preferred_element_type=jnp.float32
    )

    @pl.when(k == pl.num_programs(2) - 1)
    def _():
        o_ref[...] = (acc_ref[...] + b_ref[...]).astype(o_ref.dtype)


# ----------------------------------------------------------------------------- params
class FlattenHeadParams(NamedTuple):
    wp: jax.Array          # [nf_pad, tw_pad], pre-transposed weight, compute dtype
    bp: jax.Array          # [1, tw_pad], f32 bias
    nf: int
    target_window: int
    tk: int
    k_tiles: int
    nf_pad: int
    tn: int
    n_tiles: int
    tw_pad: int


def prepare_flatten_head_params(
    weight,
    bias,
    *,
    compute_dtype=None,        # None -> keep weight dtype (f32 == PyTorch numerics)
    tile_n: int = 256,
    tile_k: int = 2048,
    prefer_single_k_tile: bool = True,
):
    """One-time parameter preprocessing (do this at model init, not per forward)."""
    target_window, nf = weight.shape
    dt = weight.dtype if compute_dtype is None else compute_dtype
    tk, k_tiles, nf_pad, tn, n_tiles, tw_pad = _kn_geometry(
        nf, target_window, tile_n, tile_k, jnp.dtype(dt).itemsize, prefer_single_k_tile
    )
    wp = (
        jnp.zeros((nf_pad, tw_pad), dt)
        .at[:nf, :target_window]
        .set(weight.T.astype(dt))
    )
    bp = (
        jnp.zeros((1, tw_pad), jnp.float32)
        .at[0, :target_window]
        .set(bias.astype(jnp.float32))
    )
    return FlattenHeadParams(wp, bp, nf, target_window, tk, k_tiles, nf_pad, tn, n_tiles, tw_pad)


# ----------------------------------------------------------------------------- forward
def flatten_head_forward(x, params: FlattenHeadParams, *, tile_m: int = 256):
    """FlattenHead forward. x: [B, n_vars, d_model, patch_num]."""
    B, n_vars, d_model, patch_num = x.shape
    nf = d_model * patch_num
    assert nf == params.nf, "x feature size does not match prepared params"
    out_dtype = x.dtype

    # ---- Flatten(start_dim=-2): row-major over (d_model, patch_num) -> nf ----
    M = B * n_vars
    x2d = x.reshape(M, nf)

    # ---- M tiling (balanced; >=2 parallel tiles when cheap) ----
    tm, m_tiles, m_pad = _m_geometry(M, tile_m, params.n_tiles)

    # ---- Clamp tm to the VMEM budget (tiles fit the budget, not the reverse) ----
    budget = _vmem_budget_bytes()
    x_it = jnp.dtype(x.dtype).itemsize
    w_it = jnp.dtype(params.wp.dtype).itemsize
    out_it = jnp.dtype(out_dtype).itemsize
    while (
        tm > 8
        and _vmem_needed(tm, params.tk, params.tn, x_it, w_it, out_it, params.k_tiles) > budget
    ):
        tm = max(8, _round_up(tm // 2, 8))
        m_tiles = _cdiv(_round_up(M, 8), tm)
        m_pad = m_tiles * tm

    # ---- Pad x only when actually required (kept in its native dtype) ----
    if m_pad != M or params.nf_pad != nf:
        x2d = jnp.pad(x2d, ((0, m_pad - M), (0, params.nf_pad - nf)))

    vmem_needed = _vmem_needed(tm, params.tk, params.tn, x_it, w_it, out_it, params.k_tiles)
    vmem_limit = int(min(budget, max(32 * 2**20, 2 * vmem_needed)))

    cost = pl.CostEstimate(
        flops=2 * M * nf * params.target_window,
        transcendentals=0,
        bytes_accessed=(
            M * nf * x_it
            + params.nf_pad * params.tw_pad * w_it
            + params.tw_pad * 4
            + M * params.target_window * out_it
        ),
    )

    tn, n_tiles, tk, k_tiles = params.tn, params.n_tiles, params.tk, params.k_tiles

    if k_tiles == 1:
        grid = (m_tiles, n_tiles)
        in_specs = [
            pl.BlockSpec((tm, tk), lambda i, j: (i, 0)),
            pl.BlockSpec((tk, tn), lambda i, j: (0, j)),
            pl.BlockSpec((1, tn), lambda i, j: (0, j)),
        ]
        out_specs = pl.BlockSpec((tm, tn), lambda i, j: (i, j))
        scratch_shapes = []
        kernel = _fh_kernel_single_k
        dims = ("parallel", "parallel")
    else:
        grid = (m_tiles, n_tiles, k_tiles)
        in_specs = [
            pl.BlockSpec((tm, tk), lambda i, j, k: (i, k)),
            pl.BlockSpec((tk, tn), lambda i, j, k: (k, j)),
            pl.BlockSpec((1, tn), lambda i, j, k: (0, j)),
        ]
        out_specs = pl.BlockSpec((tm, tn), lambda i, j, k: (i, j))
        scratch_shapes = [pltpu.VMEM((tm, tn), jnp.float32)]
        kernel = _fh_kernel_multi_k
        dims = ("parallel", "parallel", "arbitrary")

    out = pl.pallas_call(
        kernel,
        out_shape=jax.ShapeDtypeStruct((m_pad, params.tw_pad), out_dtype),
        grid_spec=pltpu.PrefetchScalarGridSpec(
            num_scalar_prefetch=0,
            grid=grid,
            in_specs=in_specs,
            out_specs=out_specs,
            scratch_shapes=scratch_shapes,
        ),
        compiler_params=pltpu.CompilerParams(
            dimension_semantics=dims,
            vmem_limit_bytes=vmem_limit,
        ),
        cost_estimate=cost,
    )(x2d, params.wp, params.bp)

    # TODO(synk): Dropout with p>0 in training mode would need pltpu.prng_* masking;
    # head_dropout=0 / eval mode is an identity, so it is omitted here.
    return out[:M, : params.target_window].reshape(B, n_vars, params.target_window)


# ----------------------------------------------------------------------------- reference
def reference_forward(x, weight, bias):
    B, n_vars, d_model, patch_num = x.shape
    nf = d_model * patch_num
    return jnp.einsum("bvk,tk->bvt", x.reshape(B, n_vars, nf), weight) + bias


if __name__ == "__main__":
    # Small, module-consistent shapes.
    B, n_vars, d_model, patch_num = 2, 4, 16, 16
    nf = d_model * patch_num            # 256
    target_window = 24

    key = jax.random.PRNGKey(0)
    kx, kw, kb = jax.random.split(key, 3)

    x = jax.random.normal(kx, (B, n_vars, d_model, patch_num), dtype=jnp.float32)

    # nn.Linear default init: U(-1/sqrt(nf), 1/sqrt(nf)) for weight and bias.
    bound = 1.0 / sqrt(nf)
    weight = jax.random.uniform(kw, (target_window, nf), jnp.float32, -bound, bound)
    bias = jax.random.uniform(kb, (target_window,), jnp.float32, -bound, bound)

    ref = reference_forward(x, weight, bias)

    # Default f32 path (matches PyTorch numerics); single-K fast path, weight prep hoisted.
    params_f32 = prepare_flatten_head_params(weight, bias)
    out_f32 = jax.block_until_ready(flatten_head_forward(x, params_f32))
    assert out_f32.shape == (B, n_vars, target_window)
    assert jnp.allclose(out_f32, ref, atol=1e-5, rtol=1e-5), "f32 path mismatch vs reference"

    # Explicit opt-in bf16 weight stream; x stays f32 in HBM and is cast in-kernel.
    params_bf16 = prepare_flatten_head_params(weight, bias, compute_dtype=jnp.bfloat16)
    out_bf16 = jax.block_until_ready(flatten_head_forward(x, params_bf16))
    assert out_bf16.shape == (B, n_vars, target_window)
    assert jnp.allclose(out_bf16, ref, atol=3e-2, rtol=3e-2), "bf16 path mismatch vs reference"

    # Force the multi-K (accumulator) path to exercise the K-tiled kernel structure.
    params_kt = prepare_flatten_head_params(
        weight, bias, tile_k=128, prefer_single_k_tile=False
    )
    out_kt = jax.block_until_ready(flatten_head_forward(x, params_kt))
    assert out_kt.shape == (B, n_vars, target_window)
    assert jnp.allclose(out_kt, ref, atol=1e-5, rtol=1e-5), "K-tiled path mismatch vs reference"

    print("KERNEL_OK")
</pallas_src>

<mosaic_0001>
module attributes {stable_mosaic.version = 11 : i64} {
  func.func @_fh_kernel_single_k(%arg0: i32, %arg1: i32, %arg2: memref<8x256xf32, #tpu.memory_space<vmem>>, %arg3: memref<256x128xf32, #tpu.memory_space<vmem>>, %arg4: memref<1x128xf32, #tpu.memory_space<vmem>>, %arg5: memref<8x128xf32, #tpu.memory_space<vmem>>) attributes {dimension_semantics = [#tpu.dimension_semantics<parallel>, #tpu.dimension_semantics<parallel>], iteration_bounds = array<i64: 1, 1>, scalar_prefetch = 0 : i64, scratch_operands = 0 : i64, tpu.core_type = #tpu.core_type<tc>, window_params = [{transform_indices = @transform_0, window_bounds = array<i64: 8, 256>}, {transform_indices = @transform_1, window_bounds = array<i64: 256, 128>}, {transform_indices = @transform_2, window_bounds = array<i64: 1, 128>}, {transform_indices = @transform_3, window_bounds = array<i64: 8, 128>}]} {
    %c0 = arith.constant 0 : index
    %c0_0 = arith.constant 0 : index
    %0 = vector.load %arg2[%c0, %c0_0] : memref<8x256xf32, #tpu.memory_space<vmem>>, vector<8x256xf32>
    %c0_1 = arith.constant 0 : index
    %c0_2 = arith.constant 0 : index
    %1 = vector.load %arg3[%c0_1, %c0_2] : memref<256x128xf32, #tpu.memory_space<vmem>>, vector<256x128xf32>
    %cst = arith.constant dense<0.000000e+00> : vector<8x128xf32>
    %2 = tpu.matmul %0, %1, %cst {dimension_numbers = #tpu.dot_dimension_numbers<[1], [0], [0], [1], [0, 0, 1, 1], [], []>} : vector<8x256xf32>, vector<256x128xf32>, vector<8x128xf32> -> vector<8x128xf32>
    %c0_3 = arith.constant 0 : index
    %c0_4 = arith.constant 0 : index
    %3 = vector.load %arg4[%c0_3, %c0_4] : memref<1x128xf32, #tpu.memory_space<vmem>>, vector<1x128xf32>
    %4 = vector.broadcast %3 : vector<1x128xf32> to vector<8x128xf32>
    %5 = arith.addf %2, %4 : vector<8x128xf32>
    %c0_5 = arith.constant 0 : index
    %c0_6 = arith.constant 0 : index
    %6 = vector.load %arg5[%c0_5, %c0_6] : memref<8x128xf32, #tpu.memory_space<vmem>>, vector<8x128xf32>
    tpu.vector_store %arg5[%c0_5, %c0_6], %5 {strides = array<i32>} : memref<8x128xf32, #tpu.memory_space<vmem>>, vector<8x128xf32>,
    return
  }
  func.func @transform_0(%arg0: i32, %arg1: i32) -> (i32, i32) {
    %c0_i32 = arith.constant 0 : i32
    %c0_i32_0 = arith.constant 0 : i32
    return %arg0, %c0_i32 : i32, i32
  }
  func.func @transform_1(%arg0: i32, %arg1: i32) -> (i32, i32) {
    %c0_i32 = arith.constant 0 : i32
    %c0_i32_0 = arith.constant 0 : i32
    return %c0_i32, %arg1 : i32, i32
  }
  func.func @transform_2(%arg0: i32, %arg1: i32) -> (i32, i32) {
    %c0_i32 = arith.constant 0 : i32
    %c0_i32_0 = arith.constant 0 : i32
    return %c0_i32, %arg1 : i32, i32
  }
  func.func @transform_3(%arg0: i32, %arg1: i32) -> (i32, i32) {
    %c0_i32 = arith.constant 0 : i32
    return %arg0, %arg1 : i32, i32
  }
}

</mosaic_0001>

<bundles_post_ra>
// kernel: tpu_custom_call.1
= control target key start
LH: loop header
LB: loop body
LE: loop exit
PB: predicated region body
PF: predicated region fallthrough
CT: control target
= control target key end

     0   :  { %8 = vsyncpa [#allocation3], 0  ;;  %s263_s0 = inlined_call_operand.hbm [shape: f32[8,256], index: 0, kind: input, shape index: {}]   ;;  %s264_s1 = inlined_call_operand.hbm [shape: f32[256,128], index: 1, kind: input, shape index: {}]   ;;  %s265_s2 = inlined_call_operand.vmem [shape: f32[1,128], index: 2, kind: input, shape index: {}]   ;;  %s266_s3 = inlined_call_operand.hbm [shape: f32[8,128], index: 3, kind: output, shape index: {}]  }
   0x1   :  { %9 = vsyncpa [#allocation6], 0 }
   0x2   :  { %10 = vsyncpa [#allocation4], 0  ;;  %s16_s14 = sshll.u32 %s263_s0, 4  ;;  %s226_s15 = smov [#allocation2]   ;;  %s17_s14 = int_to_ptr.hbm [resolvable:$true] %s16_s14 }
   0x3   :  { %s18_s16 = sshll.u32 %s226_s15, 4  ;;  %s26_s19 = sshll.u32 %s264_s1, 4  ;;  %s19_s16 = int_to_ptr.vmem [resolvable:$true] %s18_s16  ;;  %s27_s19 = int_to_ptr.hbm [resolvable:$true] %s26_s19 }
   0x4   :  { %21 = dma.hbm_to_vmem [thread:$0]  %s17_s14, 256, %s19_s16, [#allocation3]  }
   0x5   :  { %s227_s20 = smov [#allocation5]   ;;  %s228_s22 = smov 128  }
   0x6   :  { %s28_s21 = sshll.u32 %s227_s20, 4  ;;  %s229_s23 = smov 8   ;;  %s29_s21 = int_to_ptr.vmem [resolvable:$true] %s28_s21 }
   0x7   :  { %34 = dma.hbm_to_vmem [thread:$0]  %s27_s19, 4096, %s29_s21, [#allocation6], %s228_s22, %s228_s22, %s229_s23  }
   0x8   :  { %220 = dma.done.wait [#allocation3], 256  }
   0x9   :  { %221 = vsyncadd [#allocation3], 4294967040 }
   0xa   :  { %222 = dma.done.wait [#allocation6], 4096  }
   0xb   :  { %223 = vsyncadd [#allocation6], 4294963200  ;;  %v62_v0 = vld [vmem:[#allocation5 + $0x78] sm:$0xff]  ;;  %v61_v1 = vld [vmem:[#allocation5 + $0x70] sm:$0xff]  ;;  %s230_s24 = smov [#allocation7]   ;;  %s131_s28 = sshll.u32 %s266_s3, 4  ;;  %s132_s28 = int_to_ptr.hbm [resolvable:$true] %s131_s28 }
   0xc   :  { %v78_v2 = vld [vmem:[#allocation5 + $0xf8] sm:$0xff]  ;;  %83 = vmatpush.msra.mxu0 %v62_v0  ;;  %v77_v3 = vld [vmem:[#allocation5 + $0xf0] sm:$0xff]  ;;  %v60_v4 = vld [vmem:[#allocation5 + $0x68] sm:$0xff]  ;;  %s129_s25 = sshll.u32 %s230_s24, 4  ;;  %s130_s25 = int_to_ptr.vmem [resolvable:$true] %s129_s25 }
   0xd   :  { %103 = vmatpush.msra.mxu1 %v78_v2  ;;  %v76_v5 = vld [vmem:[#allocation5 + $0xe8] sm:$0xff]  ;;  %v59_v6 = vld [vmem:[#allocation5 + $0x60] sm:$0xff]  ;;  %v58_v8 = vld [vmem:[#allocation5 + $0x58] sm:$0xff] }
   0xe   :  { %84 = vmatpush.msra.mxu0 %v61_v1  ;;  %v75_v7 = vld [vmem:[#allocation5 + $0xe0] sm:$0xff]  ;;  %v74_v9 = vld [vmem:[#allocation5 + $0xd8] sm:$0xff]  ;;  %v57_v10 = vld [vmem:[#allocation5 + $0x50] sm:$0xff] }
   0xf   :  { %104 = vmatpush.msra.mxu1 %v77_v3  ;;  %v73_v11 = vld [vmem:[#allocation5 + $0xd0] sm:$0xff]  ;;  %v56_v12 = vld [vmem:[#allocation5 + $0x48] sm:$0xff]  ;;  %v55_v14 = vld [vmem:[#allocation5 + $0x40] sm:$0xff] }
  0x10   :  { %85 = vmatpush.msra.mxu0 %v60_v4  ;;  %v72_v13 = vld [vmem:[#allocation5 + $0xc8] sm:$0xff]  ;;  %v71_v15 = vld [vmem:[#allocation5 + $0xc0] sm:$0xff]  ;;  %v54_v16 = vld [vmem:[#allocation5 + $0x38] sm:$0xff] }
  0x11   :  { %105 = vmatpush.msra.mxu1 %v76_v5  ;;  %v70_v17 = vld [vmem:[#allocation5 + $0xb8] sm:$0xff]  ;;  %v53_v18 = vld [vmem:[#allocation5 + $0x30] sm:$0xff]  ;;  %v52_v20 = vld [vmem:[#allocation5 + $0x28] sm:$0xff] }
  0x12   :  { %86 = vmatpush.msra.mxu0 %v59_v6  ;;  %v69_v19 = vld [vmem:[#allocation5 + $0xb0] sm:$0xff]  ;;  %v68_v21 = vld [vmem:[#allocation5 + $0xa8] sm:$0xff]  ;;  %v51_v22 = vld [vmem:[#allocation5 + $0x20] sm:$0xff] }
  0x13   :  { %106 = vmatpush.msra.mxu1 %v75_v7  ;;  %v67_v23 = vld [vmem:[#allocation5 + $0xa0] sm:$0xff]  ;;  %v50_v24 = vld [vmem:[#allocation5 + $0x18] sm:$0xff]  ;;  %v49_v26 = vld [vmem:[#allocation5 + $0x10] sm:$0xff] }
  0x14   :  { %87 = vmatpush.msra.mxu0 %v58_v8  ;;  %v66_v25 = vld [vmem:[#allocation5 + $0x98] sm:$0xff]  ;;  %v65_v27 = vld [vmem:[#allocation5 + $0x90] sm:$0xff]  ;;  %v48_v28 = vld [vmem:[#allocation5 + $0x8] sm:$0xff] }
  0x15   :  { %107 = vmatpush.msra.mxu1 %v74_v9  ;;  %v64_v29 = vld [vmem:[#allocation5 + $0x88] sm:$0xff]  ;;  %v47_v30 = vld [vmem:[#allocation5] sm:$0xff]  ;;  %v45_v32 = vld [vmem:[#allocation2] sm:$0xff] }
  0x16   :  { %88 = vmatpush.msra.mxu0 %v57_v10  ;;  %v63_v31 = vld [vmem:[#allocation5 + $0x80] sm:$0xff]  ;;  %v46_v33 = vld [vmem:[#allocation2 + $0x8] sm:$0xff]  ;;  %v147_v34 = vld [vmem:[%s265_s2] ss:$0 sm:$0xff] }
  0x17   :  { %108 = vmatpush.msra.mxu1 %v73_v11 }
  0x18   :  { %89 = vmatpush.msra.mxu0 %v56_v12 }
  0x19   :  { %109 = vmatpush.msra.mxu1 %v72_v13 }
  0x1a   :  { %90 = vmatpush.msra.mxu0 %v55_v14 }
  0x1b   :  { %110 = vmatpush.msra.mxu1 %v71_v15 }
  0x1c   :  { %91 = vmatpush.msra.mxu0 %v54_v16 }
  0x1d   :  { %111 = vmatpush.msra.mxu1 %v70_v17 }
  0x1e   :  { %92 = vmatpush.msra.mxu0 %v53_v18 }
  0x1f   :  { %112 = vmatpush.msra.mxu1 %v69_v19 }
  0x20   :  { %93 = vmatpush.msra.mxu0 %v52_v20 }
  0x21   :  { %113 = vmatpush.msra.mxu1 %v68_v21 }
  0x22   :  { %94 = vmatpush.msra.mxu0 %v51_v22 }
  0x23   :  { %114 = vmatpush.msra.mxu1 %v67_v23 }
  0x24   :  { %95 = vmatpush.msra.mxu0 %v50_v24 }
  0x25   :  { %115 = vmatpush.msra.mxu1 %v66_v25 }
  0x26   :  { %96 = vmatpush.msra.mxu0 %v49_v26 }
  0x27   :  { %116 = vmatpush.msra.mxu1 %v65_v27 }
  0x28   :  { %97 = vmatpush.msra.mxu0 %v48_v28 }
  0x29   :  { %117 = vmatpush.msra.mxu1 %v64_v29 }
  0x2a   :  { %98 = vmatpush.msra.mxu0 %v47_v30 }
  0x2b   :  { %118 = vmatpush.msra.mxu1 %v63_v31  ;;  %99 = vmatmul.f32.vlgmr.msra.gmra.mxu0 %v45_v32 }
  0x2c   :  { %119 = vmatmul.f32.vlgmr.msra.gmra.mxu1 %v46_v33 }
  0xa8   :  { %v100_v35 = vpop.f32.mrf.mxu0 }
  0xa9   :  { %v120_v36 = vpop.f32.mrf.mxu1  ;;  %v101_v37 = vadd.f32 %v147_v34, %v100_v35 }
  0xab   :  { %v121_v38 = vadd.f32 %v120_v36, %v101_v37 }
  0xad   :  { %123 = vst [vmem:[#allocation7] sm:$0xff] %v121_v38 }
  0xae   :  { %134 = dma.vmem_to_hbm [thread:$0]  %s130_s25, 128, %s132_s28, [#allocation4]  }
  0xaf   :  { %224 = dma.done.wait [#allocation4], 128  }
  0xb0   :  { %225 = vsyncadd [#allocation4], 4294967168 }
  0xb1   :  { %139 = vsyncpa [#allocation3], 1 }
  0xb2   :  { %140 = vsyncpa [#allocation6], 1 }
  0xb3   :  { %141 = vsyncpa [#allocation4], 1 }

</bundles_post_ra>
